<compile_context>
chip_gen: v6e
topology: v6e:2x2x1
jax: 0.10.0
libtpu: 0.0.40
codegen_flags: <defaults>
</compile_context>

<pallas_src>
import functools

import numpy as np

import jax
import jax.numpy as jnp
from jax.experimental import pallas as pl
from jax.experimental.pallas import tpu as pltpu


def _round_up(x: int, m: int) -> int:
    return (x + m - 1) // m * m


def _cdiv(a: int, b: int) -> int:
    return (a + b - 1) // b


def _spec(block_shape, index_map, buffer_count=None):
    """BlockSpec helper; degrades gracefully if pipeline_mode is unsupported."""
    if buffer_count is None:
        return pl.BlockSpec(block_shape, index_map)
    try:
        return pl.BlockSpec(block_shape, index_map,
                            pipeline_mode=pl.Buffered(buffer_count))
    except Exception:  # older jax without pipeline_mode / Buffered
        return pl.BlockSpec(block_shape, index_map)


def _vmem_cap_bytes() -> int:
    try:
        return int(pltpu.get_tpu_info().vmem_capacity_bytes)
    except Exception:
        return 64 << 20  # conservative (v7x per-TensorCore)


# ----------------------------------------------------------------------------
# Kernels
# ----------------------------------------------------------------------------
def _crossnet_resident_kernel(x_ref, wt_ref, b_ref, o_ref, *, num_layers):
    """Resident-weight path.  x_ref: [TB, Dp], wt_ref: [L, Dp, Dp] (W^T),
    b_ref: [L, Dp] f32, o_ref: [TB, Dp]."""
    x0 = x_ref[...].astype(jnp.float32)
    xi = x0
    mxu_dtype = wt_ref.dtype
    b_all = b_ref[...]                         # [L, Dp] f32, loaded once
    for l in range(num_layers):                # static -> fully unrolled
        z = jnp.dot(xi.astype(mxu_dtype), wt_ref[l],
                    preferred_element_type=jnp.float32) + b_all[l:l + 1, :]
        xi = xi + x0 * z                       # f32 residual update
    o_ref[...] = xi.astype(o_ref.dtype)


def _crossnet_streaming_kernel(x_ref, wt_ref, b_ref, o_ref, x0_sc, xi_sc,
                               *, num_layers):
    """Layer-streaming path.  grid = (batch_tile, layer).
    x_ref: [TB, Dp], wt_ref: [1, Dp, Dp] (layer l's W^T), b_ref: [1, Dp] f32,
    o_ref: [TB, Dp]; x0_sc / xi_sc: f32 VMEM scratch carried across layers."""
    l = pl.program_id(1)

    @pl.when(l == 0)
    def _():
        x0 = x_ref[...].astype(jnp.float32)
        x0_sc[...] = x0
        xi_sc[...] = x0

    xi = xi_sc[...]
    z = jnp.dot(xi.astype(wt_ref.dtype), wt_ref[0],
                preferred_element_type=jnp.float32) + b_ref[...]
    xi = xi + x0_sc[...] * z
    xi_sc[...] = xi

    @pl.when(l == num_layers - 1)
    def _():
        o_ref[...] = xi.astype(o_ref.dtype)


# ----------------------------------------------------------------------------
# Host-side wrappers
# ----------------------------------------------------------------------------
def prepare_params(weights, biases, matmul_dtype=jnp.bfloat16):
    """One-time parameter prep -- call OUTSIDE the per-step forward.
    weights: [L, D, D] in nn.Linear (out, in) layout; biases: [L, D].
    Returns (w_t, b): feature dim zero-padded to a multiple of 128, weights
    transposed to [L, Dp_in, Dp_out] and cast to matmul_dtype, biases f32.
    Zero padding is exact for this op (padded lanes of X_0 are zero, so the
    multiplicative residual keeps padded lanes at zero)."""
    L, D, _ = weights.shape
    Dp = max(128, _round_up(D, 128))
    w, b = weights, biases
    if Dp != D:
        w = jnp.pad(w, ((0, 0), (0, Dp - D), (0, Dp - D)))
        b = jnp.pad(b, ((0, 0), (0, Dp - D)))
    w_t = jnp.transpose(w, (0, 2, 1)).astype(matmul_dtype)  # [L, Dp_in, Dp_out]
    return w_t, b.astype(jnp.float32)


def _choose_batch_tiling(B, block_b):
    n_tiles = max(1, _cdiv(B, block_b))
    # Give v7x's second TensorCore work on medium single-tile batches.
    if n_tiles == 1 and B >= 256:
        n_tiles = 2
    TB = max(8, _round_up(_cdiv(B, n_tiles), 8))   # minimal 8-aligned tile
    Bp = _round_up(B, TB)                          # small padding waste
    return TB, Bp


def crossnet_v2_forward(x, w_t, b, *, block_b=512,
                        activation_dtype=jnp.bfloat16,
                        resident_param_bytes_limit=16 << 20):
    """x: [B, D]; (w_t, b) from prepare_params."""
    B, D = x.shape
    L, Dp, _ = w_t.shape
    act_dtype = jnp.dtype(activation_dtype)

    # Pad features to the lane-dense width, pad batch to the chosen tiling,
    # and stream activations in bf16 (kernel math stays f32).
    x_p = x
    if D != Dp:
        x_p = jnp.pad(x_p, ((0, 0), (0, Dp - D)))
    TB, Bp = _choose_batch_tiling(B, block_b)
    if Bp != B:
        x_p = jnp.pad(x_p, ((0, Bp - B), (0, 0)))
    materialized = (D != Dp) or (Bp != B) or (jnp.dtype(x.dtype) != act_dtype)
    x_p = x_p.astype(act_dtype)

    abytes = act_dtype.itemsize
    wbytes = jnp.dtype(w_t.dtype).itemsize
    param_bytes = L * Dp * Dp * wbytes + L * Dp * 4
    use_resident = param_bytes <= resident_param_bytes_limit

    cost = pl.CostEstimate(
        flops=2 * L * Bp * Dp * Dp + 3 * L * Bp * Dp,
        transcendentals=0,
        bytes_accessed=2 * Bp * Dp * abytes + param_bytes,
    )
    # Only alias when x_p is a fresh buffer (never a live user buffer).
    alias = {0: 0} if materialized else {}

    if use_resident:
        vmem_budget = (
            2 * 2 * TB * Dp * abytes          # double-buffered x / out tiles
            + param_bytes                     # single-buffered resident params
            + 8 * TB * Dp * 4                 # f32 intermediates (x0, xi, z)
            + (4 << 20)                       # headroom
        )
        grid = (Bp // TB,)
        in_specs = [
            _spec((TB, Dp), lambda i: (i, 0)),                         # stream x
            _spec((L, Dp, Dp), lambda i: (0, 0, 0), buffer_count=1),   # resident
            _spec((L, Dp), lambda i: (0, 0), buffer_count=1),          # resident
        ]
        out_specs = pl.BlockSpec((TB, Dp), lambda i: (i, 0))
        kernel = functools.partial(_crossnet_resident_kernel, num_layers=L)
        scratch = ()
        dims = ("parallel",)
    else:
        vmem_budget = (
            2 * 2 * TB * Dp * abytes          # double-buffered x / out tiles
            + 2 * (Dp * Dp * wbytes + Dp * 4) # double-buffered per-layer params
            + 2 * TB * Dp * 4                 # x0 / xi scratch
            + 6 * TB * Dp * 4                 # f32 intermediates
            + (4 << 20)
        )
        grid = (Bp // TB, L)
        in_specs = [
            _spec((TB, Dp), lambda i, l: (i, 0)),        # x fetched once per tile
            _spec((1, Dp, Dp), lambda i, l: (l, 0, 0)),  # layer-l weight streamed
            _spec((1, Dp), lambda i, l: (l, 0)),         # layer-l bias streamed
        ]
        out_specs = pl.BlockSpec((TB, Dp), lambda i, l: (i, 0))
        kernel = functools.partial(_crossnet_streaming_kernel, num_layers=L)
        scratch = (pltpu.VMEM((TB, Dp), jnp.float32),
                   pltpu.VMEM((TB, Dp), jnp.float32))
        dims = ("parallel", "arbitrary")

    # Generation-aware VMEM cap (v5e/v6e: 128 MiB physical; v7x: 64 MiB).
    vmem_limit = int(min(max(vmem_budget, 16 << 20),
                         int(_vmem_cap_bytes() * 0.85)))

    out_p = pl.pallas_call(
        kernel,
        out_shape=jax.ShapeDtypeStruct((Bp, Dp), act_dtype),
        grid=grid,
        in_specs=in_specs,
        out_specs=out_specs,
        scratch_shapes=scratch,
        input_output_aliases=alias,
        cost_estimate=cost,
        compiler_params=pltpu.CompilerParams(
            dimension_semantics=dims,
            vmem_limit_bytes=vmem_limit,
        ),
    )(x_p, w_t, b)

    return out_p[:B, :D].astype(x.dtype)


def crossnet_v2(x, weights, biases, matmul_dtype=jnp.bfloat16):
    """Convenience wrapper: param prep + forward.  In production hoist
    prepare_params out of the per-step call (weight-stationary)."""
    w_t, b = prepare_params(weights, biases, matmul_dtype)
    return crossnet_v2_forward(x, w_t, b)


def crossnet_v2_reference(x, weights, biases):
    """Exact float64 numpy reference matching the PyTorch module."""
    x0 = np.asarray(x, dtype=np.float64)
    w = np.asarray(weights, dtype=np.float64)
    b = np.asarray(biases, dtype=np.float64)
    xi = x0
    for l in range(w.shape[0]):
        xi = xi + x0 * (xi @ w[l].T + b[l])
    return xi


if __name__ == "__main__":
    # Small shapes consistent with the module: batch=8, input_dim=32, 3 layers.
    B, D, L = 8, 32, 3
    key = jax.random.PRNGKey(0)
    kx, kw, kb = jax.random.split(key, 3)

    x = jax.random.normal(kx, (B, D), dtype=jnp.float32)
    # Deterministic init mimicking nn.Linear's uniform(-1/sqrt(D), 1/sqrt(D)).
    bound = 1.0 / (D ** 0.5)
    weights = jax.random.uniform(kw, (L, D, D), minval=-bound, maxval=bound,
                                 dtype=jnp.float32)
    biases = jax.random.uniform(kb, (L, D), minval=-bound, maxval=bound,
                                dtype=jnp.float32)

    w_t, b_p = prepare_params(weights, biases, matmul_dtype=jnp.bfloat16)
    ref = crossnet_v2_reference(x, weights, biases)

    # 1) Resident-weight path (default).
    fwd = jax.jit(crossnet_v2_forward)
    out = jax.block_until_ready(fwd(x, w_t, b_p))
    assert out.shape == (B, D)
    assert np.allclose(np.asarray(out, dtype=np.float64), ref,
                       atol=5e-2, rtol=5e-2), "resident path mismatch"

    # 2) Layer-streaming path (forced here; used automatically when L*Dp^2 is
    #    too large to keep resident, e.g. wide D on v7x's 64 MiB VMEM).
    fwd_stream = jax.jit(functools.partial(crossnet_v2_forward,
                                           resident_param_bytes_limit=0))
    out_s = jax.block_until_ready(fwd_stream(x, w_t, b_p))
    assert np.allclose(np.asarray(out_s, dtype=np.float64), ref,
                       atol=5e-2, rtol=5e-2), "streaming path mismatch"

    # 3) Multi-tile batch with padding (exercises adaptive tiling + aliasing).
    B2 = 40
    x2 = jax.random.normal(kx, (B2, D), dtype=jnp.float32)
    ref2 = crossnet_v2_reference(x2, weights, biases)
    out2 = jax.block_until_ready(
        jax.jit(functools.partial(crossnet_v2_forward, block_b=16))(x2, w_t, b_p))
    assert out2.shape == (B2, D)
    assert np.allclose(np.asarray(out2, dtype=np.float64), ref2,
                       atol=5e-2, rtol=5e-2), "multi-tile path mismatch"

    print("KERNEL_OK")
</pallas_src>

<mosaic_0001>
module attributes {stable_mosaic.version = 11 : i64} {
  func.func @_crossnet_resident_kernel(%arg0: i32, %arg1: memref<8x128xbf16, #tpu.memory_space<vmem>>, %arg2: memref<3x128x128xbf16, #tpu.memory_space<vmem>>, %arg3: memref<3x128xf32, #tpu.memory_space<vmem>>, %arg4: memref<8x128xbf16, #tpu.memory_space<vmem>>) attributes {dimension_semantics = [#tpu.dimension_semantics<parallel>], iteration_bounds = array<i64: 1>, scalar_prefetch = 0 : i64, scratch_operands = 0 : i64, tpu.core_type = #tpu.core_type<tc>, window_params = [{transform_indices = @transform_0, window_bounds = array<i64: 8, 128>}, {pipeline_mode = #tpu.pipeline_mode<synchronous>, transform_indices = @transform_1, window_bounds = array<i64: 3, 128, 128>}, {pipeline_mode = #tpu.pipeline_mode<synchronous>, transform_indices = @transform_2, window_bounds = array<i64: 3, 128>}, {transform_indices = @transform_3, window_bounds = array<i64: 8, 128>}]} {
    %c0 = arith.constant 0 : index
    %c0_0 = arith.constant 0 : index
    %0 = vector.load %arg1[%c0, %c0_0] : memref<8x128xbf16, #tpu.memory_space<vmem>>, vector<8x128xbf16>
    %1 = arith.extf %0 : vector<8x128xbf16> to vector<8x128xf32>
    %c0_1 = arith.constant 0 : index
    %c0_2 = arith.constant 0 : index
    %2 = vector.load %arg3[%c0_1, %c0_2] : memref<3x128xf32, #tpu.memory_space<vmem>>, vector<3x128xf32>
    %3 = arith.truncf %1 : vector<8x128xf32> to vector<8x128xbf16>
    %c0_3 = arith.constant 0 : index
    %c0_4 = arith.constant 0 : index
    %c0_5 = arith.constant 0 : index
    %4 = vector.load %arg2[%c0_3, %c0_4, %c0_5] : memref<3x128x128xbf16, #tpu.memory_space<vmem>>, vector<1x128x128xbf16>
    %5 = vector.shape_cast %4 : vector<1x128x128xbf16> to vector<128x128xbf16>
    %cst = arith.constant dense<0.000000e+00> : vector<8x128xf32>
    %6 = tpu.matmul %3, %5, %cst {dimension_numbers = #tpu.dot_dimension_numbers<[1], [0], [0], [1], [0, 0, 1, 1], [], []>} : vector<8x128xbf16>, vector<128x128xbf16>, vector<8x128xf32> -> vector<8x128xf32>
    %7 = vector.extract_strided_slice %2 {offsets = [0, 0], sizes = [1, 128], strides = [1, 1]} : vector<3x128xf32> to vector<1x128xf32>
    %8 = vector.broadcast %7 : vector<1x128xf32> to vector<8x128xf32>
    %9 = arith.addf %6, %8 : vector<8x128xf32>
    %10 = arith.mulf %1, %9 : vector<8x128xf32>
    %11 = arith.addf %1, %10 : vector<8x128xf32>
    %12 = arith.truncf %11 : vector<8x128xf32> to vector<8x128xbf16>
    %c1 = arith.constant 1 : index
    %c0_6 = arith.constant 0 : index
    %c0_7 = arith.constant 0 : index
    %13 = vector.load %arg2[%c1, %c0_6, %c0_7] : memref<3x128x128xbf16, #tpu.memory_space<vmem>>, vector<1x128x128xbf16>
    %14 = vector.shape_cast %13 : vector<1x128x128xbf16> to vector<128x128xbf16>
    %cst_8 = arith.constant dense<0.000000e+00> : vector<8x128xf32>
    %15 = tpu.matmul %12, %14, %cst_8 {dimension_numbers = #tpu.dot_dimension_numbers<[1], [0], [0], [1], [0, 0, 1, 1], [], []>} : vector<8x128xbf16>, vector<128x128xbf16>, vector<8x128xf32> -> vector<8x128xf32>
    %16 = vector.extract_strided_slice %2 {offsets = [1, 0], sizes = [1, 128], strides = [1, 1]} : vector<3x128xf32> to vector<1x128xf32>
    %17 = vector.broadcast %16 : vector<1x128xf32> to vector<8x128xf32>
    %18 = arith.addf %15, %17 : vector<8x128xf32>
    %19 = arith.mulf %1, %18 : vector<8x128xf32>
    %20 = arith.addf %11, %19 : vector<8x128xf32>
    %21 = arith.truncf %20 : vector<8x128xf32> to vector<8x128xbf16>
    %c2 = arith.constant 2 : index
    %c0_9 = arith.constant 0 : index
    %c0_10 = arith.constant 0 : index
    %22 = vector.load %arg2[%c2, %c0_9, %c0_10] : memref<3x128x128xbf16, #tpu.memory_space<vmem>>, vector<1x128x128xbf16>
    %23 = vector.shape_cast %22 : vector<1x128x128xbf16> to vector<128x128xbf16>
    %cst_11 = arith.constant dense<0.000000e+00> : vector<8x128xf32>
    %24 = tpu.matmul %21, %23, %cst_11 {dimension_numbers = #tpu.dot_dimension_numbers<[1], [0], [0], [1], [0, 0, 1, 1], [], []>} : vector<8x128xbf16>, vector<128x128xbf16>, vector<8x128xf32> -> vector<8x128xf32>
    %25 = vector.extract_strided_slice %2 {offsets = [2, 0], sizes = [1, 128], strides = [1, 1]} : vector<3x128xf32> to vector<1x128xf32>
    %26 = vector.broadcast %25 : vector<1x128xf32> to vector<8x128xf32>
    %27 = arith.addf %24, %26 : vector<8x128xf32>
    %28 = arith.mulf %1, %27 : vector<8x128xf32>
    %29 = arith.addf %20, %28 : vector<8x128xf32>
    %30 = arith.truncf %29 : vector<8x128xf32> to vector<8x128xbf16>
    %c0_12 = arith.constant 0 : index
    %c0_13 = arith.constant 0 : index
    %31 = vector.load %arg4[%c0_12, %c0_13] : memref<8x128xbf16, #tpu.memory_space<vmem>>, vector<8x128xbf16>
    tpu.vector_store %arg4[%c0_12, %c0_13], %30 {strides = array<i32>} : memref<8x128xbf16, #tpu.memory_space<vmem>>, vector<8x128xbf16>,
    return
  }
  func.func @transform_0(%arg0: i32) -> (i32, i32) {
    %c0_i32 = arith.constant 0 : i32
    %c0_i32_0 = arith.constant 0 : i32
    return %arg0, %c0_i32 : i32, i32
  }
  func.func @transform_1(%arg0: i32) -> (i32, i32, i32) {
    %c0_i32 = arith.constant 0 : i32
    %c0_i32_0 = arith.constant 0 : i32
    %c0_i32_1 = arith.constant 0 : i32
    %c0_i32_2 = arith.constant 0 : i32
    return %c0_i32, %c0_i32_0, %c0_i32_1 : i32, i32, i32
  }
  func.func @transform_2(%arg0: i32) -> (i32, i32) {
    %c0_i32 = arith.constant 0 : i32
    %c0_i32_0 = arith.constant 0 : i32
    %c0_i32_1 = arith.constant 0 : i32
    return %c0_i32, %c0_i32_0 : i32, i32
  }
  func.func @transform_3(%arg0: i32) -> (i32, i32) {
    %c0_i32 = arith.constant 0 : i32
    %c0_i32_0 = arith.constant 0 : i32
    return %arg0, %c0_i32 : i32, i32
  }
}

</mosaic_0001>

<bundles_post_ra>
// kernel: crossnet_v2_forward.1
= control target key start
LH: loop header
LB: loop body
LE: loop exit
PB: predicated region body
PF: predicated region fallthrough
CT: control target
= control target key end

     0   :  { %8 = vsyncpa [#allocation3], 0  ;;  %s535_s12 = smov [#allocation2]   ;;  %s602_s0 = inlined_call_operand.vmem [shape: bf16[8,128], index: 0, kind: input, shape index: {}, may-alias: {0,3}]   ;;  %s603_s1 = inlined_call_operand.hbm [shape: bf16[3,128,128], index: 1, kind: input, shape index: {}]   ;;  %s604_s2 = inlined_call_operand.vmem [shape: f32[3,128], index: 2, kind: input, shape index: {}]   ;;  %s605_s3 = inlined_call_operand.vmem [shape: bf16[8,128], index: 3, kind: output, shape index: {}, may-alias: {0,3}]  }
   0x1   :  { %s16_s13 = sshll.u32 %s535_s12, 4  ;;  %s17_s13 = int_to_ptr.vmem [resolvable:$true] %s16_s13 }
   0x2   :  { %s521_s14 = scalar_lea.vmem %s17_s13, 3072  ;;  %p526_p1 = scmp.lt.s32.totalorder %s17_s13, %s17_s13 }
   0x3   :  { %p522_p0 = scmp.ne.s32.totalorder %s17_s13, %s521_s14  ;;  %p527_p2 = scmp.lt.s32.totalorder %s521_s14, %s521_s14 }
   0x5   :  { %p528_p3 = por %p527_p2, %p526_p1 }
   0x7   :  { %p529_p4 = pnand %p528_p3, %p522_p0 }
   0x9   :  { %532 = shalt.err (!%p529_p4)
}
   0xa   :  { %s536_s15 = smov 64   ;;  %s537_s16 = smov 4  }
   0xb   :  { %22 = dma.hbm_to_vmem [thread:$0]  %s603_s1, 3072, %s17_s13, [#allocation3], %s536_s15, %s536_s15, %s537_s16  }
   0xc   :  { %533 = dma.done.wait [#allocation3], 3072  }
   0xd   :  { %534 = vsyncadd [#allocation3], 4294964224  ;;  %v538_v0 = vmov 0.0   ;;  %vm539_vm0 = vmmov 0   ;;  %v489_v1 = vld [vmem:[#allocation2 + $0x38] sm:$0xff]   ;;  %v490_v2 = vld [vmem:[#allocation2 + $0x30] sm:$0xff]   ;;  %v48_v24 = vlaneseq }
   0xe   :  { %424 = vmatprep.subr.bf16.mxu0 %v538_v0  ;;  %440 = vmatprep.mubr.msk.bf16.mxu0 %vm539_vm0, %v538_v0  ;;  %v491_v3 = vld [vmem:[#allocation2 + $0x28] sm:$0xff]   ;;  %v497_v4 = vld [vmem:[#allocation2 + $0x78] sm:$0xff]   ;;  %v492_v5 = vld [vmem:[#allocation2 + $0x20] sm:$0xff]  }
   0xf   :  { %444 = vmatprep.subr.bf16.mxu1 %v538_v0  ;;  %460 = vmatprep.mubr.msk.bf16.mxu1 %vm539_vm0, %v538_v0  ;;  %v498_v6 = vld [vmem:[#allocation2 + $0x70] sm:$0xff]   ;;  %v493_v7 = vld [vmem:[#allocation2 + $0x18] sm:$0xff]   ;;  %v499_v8 = vld [vmem:[#allocation2 + $0x68] sm:$0xff]   ;;  %v49_v25 = vshrl.u32 %v48_v24, 7 }
  0x10   :  { %425 = vmatpush3.bf16.msra.mxu0 %v489_v1  ;;  %445 = vmatpush3.bf16.msra.mxu1 %v497_v4  ;;  %v494_v9 = vld [vmem:[#allocation2 + $0x10] sm:$0xff]   ;;  %v500_v10 = vld [vmem:[#allocation2 + $0x60] sm:$0xff]   ;;  %v495_v11 = vld [vmem:[#allocation2 + $0x8] sm:$0xff]  }
  0x11   :  { %426 = vmatprep.subr.bf16.mxu0 %v538_v0  ;;  %446 = vmatprep.subr.bf16.mxu1 %v538_v0  ;;  %v501_v12 = vld [vmem:[#allocation2 + $0x58] sm:$0xff]   ;;  %v496_v13 = vld [vmem:[#allocation2] sm:$0xff]   ;;  %v502_v14 = vld [vmem:[#allocation2 + $0x50] sm:$0xff]   ;;  %v50_v26 = vsub.s32 0, %v49_v25  ;;  %v162_v40 = vsub.s32 1, %v49_v25  ;;  %v274_v50 = vsub.s32 2, %v49_v25 }
  0x12   :  { %v29_v15 = vld [vmem:[%s602_s0] sm:$0xf]  ;;  %v503_v16 = vld [vmem:[#allocation2 + $0x48] sm:$0xff]   ;;  %v505_v18 = vld [vmem:[#allocation2 + $0xb8] sm:$0xff]  }
  0x13   :  { %v504_v17 = vld [vmem:[#allocation2 + $0x40] sm:$0xff]   ;;  %v506_v19 = vld [vmem:[#allocation2 + $0xb0] sm:$0xff]   ;;  %v507_v20 = vld [vmem:[#allocation2 + $0xa8] sm:$0xff]   ;;  %v30_v29 = vunpack.c.l.bf16 %v29_v15 }
  0x14   :  { %427 = vmatpush3.bf16.msra.mxu0 %v490_v2  ;;  %447 = vmatpush3.bf16.msra.mxu1 %v498_v6  ;;  %v508_v21 = vld [vmem:[#allocation2 + $0xa0] sm:$0xff]   ;;  %v509_v22 = vld [vmem:[#allocation2 + $0x98] sm:$0xff]   ;;  %v510_v23 = vld [vmem:[#allocation2 + $0x90] sm:$0xff]  }
  0x15   :  { %428 = vmatprep.subr.bf16.mxu0 %v538_v0  ;;  %448 = vmatprep.subr.bf16.mxu1 %v538_v0  ;;  %v31_v27 = vld [vmem:[%s604_s2] sm:$0x7]  ;;  %v511_v38 = vld [vmem:[#allocation2 + $0x88] sm:$0xff]  }
  0x16   :  { %v51_v28 = vrot.slane %v31_v27, %v50_v26  ;;  %v512_v39 = vld [vmem:[#allocation2 + $0x80] sm:$0xff]   ;;  %v163_v41 = vrot.slane %v31_v27, %v162_v40  ;;  %v275_v51 = vrot.slane %v31_v27, %v274_v50 }
  0x18   :  { %429 = vmatpush3.bf16.msra.mxu0 %v491_v3  ;;  %449 = vmatpush3.bf16.msra.mxu1 %v499_v8 }
  0x19   :  { %430 = vmatprep.subr.bf16.mxu0 %v538_v0  ;;  %450 = vmatprep.subr.bf16.mxu1 %v538_v0 }
  0x1c   :  { %431 = vmatpush3.bf16.msra.mxu0 %v492_v5  ;;  %451 = vmatpush3.bf16.msra.mxu1 %v500_v10 }
  0x1d   :  { %432 = vmatprep.subr.bf16.mxu0 %v538_v0  ;;  %452 = vmatprep.subr.bf16.mxu1 %v538_v0 }
  0x20   :  { %433 = vmatpush3.bf16.msra.mxu0 %v493_v7  ;;  %453 = vmatpush3.bf16.msra.mxu1 %v501_v12 }
  0x21   :  { %434 = vmatprep.subr.bf16.mxu0 %v538_v0  ;;  %454 = vmatprep.subr.bf16.mxu1 %v538_v0 }
  0x24   :  { %435 = vmatpush3.bf16.msra.mxu0 %v494_v9  ;;  %455 = vmatpush3.bf16.msra.mxu1 %v502_v14 }
  0x25   :  { %436 = vmatprep.subr.bf16.mxu0 %v538_v0  ;;  %456 = vmatprep.subr.bf16.mxu1 %v538_v0 }
  0x28   :  { %437 = vmatpush3.bf16.msra.mxu0 %v495_v11  ;;  %457 = vmatpush3.bf16.msra.mxu1 %v503_v16 }
  0x29   :  { %438 = vmatprep.subr.bf16.mxu0 %v538_v0  ;;  %458 = vmatprep.subr.bf16.mxu1 %v538_v0 }
  0x2c   :  { %439 = vmatpush3.bf16.msra.mxu0 %v496_v13  ;;  %459 = vmatpush3.bf16.msra.mxu1 %v504_v17 }
  0x2d   :  { %464 = vmatprep.subr.bf16.mxu0 %v538_v0 }
  0x2f   :  { %441 = vmatmul.mubr.bf16.vlgmr.msra.gmra.mxu0 %v29_v15 }
  0x30   :  { %480 = vmatprep.mubr.msk.bf16.mxu0 %vm539_vm0, %v538_v0  ;;  %465 = vmatpush3.bf16.msra.mxu0 %v505_v18 }
  0x31   :  { %466 = vmatprep.subr.bf16.mxu0 %v538_v0 }
  0x34   :  { %467 = vmatpush3.bf16.msra.mxu0 %v506_v19 }
  0x35   :  { %468 = vmatprep.subr.bf16.mxu0 %v538_v0 }
  0x38   :  { %469 = vmatpush3.bf16.msra.mxu0 %v507_v20 }
  0x39   :  { %470 = vmatprep.subr.bf16.mxu0 %v538_v0 }
  0x3c   :  { %471 = vmatpush3.bf16.msra.mxu0 %v508_v21 }
  0x3d   :  { %472 = vmatprep.subr.bf16.mxu0 %v538_v0 }
  0x40   :  { %473 = vmatpush3.bf16.msra.mxu0 %v509_v22 }
  0x41   :  { %474 = vmatprep.subr.bf16.mxu0 %v538_v0 }
  0x44   :  { %475 = vmatpush3.bf16.msra.mxu0 %v510_v23 }
  0x45   :  { %476 = vmatprep.subr.bf16.mxu0 %v538_v0 }
  0x48   :  { %477 = vmatpush3.bf16.msra.mxu0 %v511_v38 }
  0x49   :  { %478 = vmatprep.subr.bf16.mxu0 %v538_v0 }
  0x4c   :  { %479 = vmatpush3.bf16.msra.mxu0 %v512_v39 }
  0xef   :  { %v134_v30 = vpop.f32.mrf.mxu0 }
  0xf0   :  { %v135_v31 = vadd.f32 %v134_v30, %v51_v28 }
  0xf1   :  { %v442_v32 = vpop.f32.mrf.mxu0 }
  0xf2   :  { %v140_v33 = vmul.f32 %v135_v31, %v30_v29 }
  0xf3   :  { %v137_v34 = vpop.f32.mrf.mxu0 }
  0xf4   :  { %v141_v35 = vadd.f32 %v140_v33, %v30_v29 }
  0xf5   :  { %v443_v36 = vpop.f32.mrf.mxu0 }
  0xf6   :  { %v142_v37 = vpack.c.bf16 %v141_v35, %v141_v35 }
  0xf8   :  { %461 = vmatmul.mubr.bf16.vlgmr.msra.gmra.mxu1 %v142_v37 }
 0x1b8   :  { %v246_v42 = vpop.f32.mrf.mxu1 }
 0x1b9   :  { %v247_v43 = vadd.f32 %v246_v42, %v163_v41 }
 0x1ba   :  { %v462_v44 = vpop.f32.mrf.mxu1 }
 0x1bb   :  { %v252_v45 = vmul.f32 %v247_v43, %v30_v29 }
 0x1bc   :  { %v249_v46 = vpop.f32.mrf.mxu1 }
 0x1bd   :  { %v253_v47 = vadd.f32 %v252_v45, %v141_v35 }
 0x1be   :  { %v463_v48 = vpop.f32.mrf.mxu1 }
 0x1bf   :  { %v254_v49 = vpack.c.bf16 %v253_v47, %v253_v47 }
 0x1c1   :  { %481 = vmatmul.mubr.bf16.vlgmr.msra.gmra.mxu0 %v254_v49 }
 0x281   :  { %v358_v52 = vpop.f32.mrf.mxu0 }
 0x282   :  { %v359_v53 = vadd.f32 %v358_v52, %v275_v51 }
 0x283   :  { %v482_v54 = vpop.f32.mrf.mxu0 }
 0x284   :  { %v364_v55 = vmul.f32 %v359_v53, %v30_v29 }
 0x285   :  { %v361_v56 = vpop.f32.mrf.mxu0 }
 0x286   :  { %v365_v57 = vadd.f32 %v364_v55, %v253_v47 }
 0x287   :  { %v483_v58 = vpop.f32.mrf.mxu0 }
 0x288   :  { %v366_v59 = vpack.c.bf16 %v365_v57, %v365_v57 }
 0x28a   :  { %367 = vst [vmem:[%s605_s3] sm:$0xf] %v366_v59 }
 0x28b   :  { %372 = vsyncpa [#allocation3], 1 }

</bundles_post_ra>
